<compile_context>
chip_gen: v5e
topology: v5e:2x2
jax: 0.10.0
libtpu: 0.0.40
codegen_flags: <defaults>
</compile_context>

<pallas_src>
import jax
import jax.numpy as jnp
from jax.experimental import pallas as pl
from jax.experimental.pallas import tpu as pltpu


def _round_up(a, b):
    return (a + b - 1) // b * b


def _default_block_bytes():
    # v5e (~0.8 TB/s HBM) already amortizes the ~0.35us/step overhead at 2 MiB;
    # v6e/v7x (1.4-3.2 TB/s) want bigger blocks to stay on the roofline.
    try:
        kind = jax.devices()[0].device_kind.lower()
    except Exception:
        return 6 << 20
    if "v5e" in kind or ("v5" in kind and "lite" in kind):
        return 2 << 20
    return 6 << 20


def _fold_factor(H, W, min_lanes=256, max_lanes=2048):
    """How many H-rows to fold into the lane axis (k | H, lanes L = k*W).

    Prefers the smallest k | H with (k*W) % 128 == 0 and k*W >= min_lanes
    (lane-dense, small MXU cost, low gamma/beta padding ratio); falls back to
    the best partial fold with k*W <= 128; else 1 (no fold)."""
    if W % 128 == 0:
        return 1
    divs = [k for k in range(1, H + 1) if H % k == 0]
    full = [k for k in divs if (k * W) % 128 == 0 and k * W <= max_lanes]
    if full:
        good = [k for k in full if k * W >= min_lanes]
        return min(good) if good else max(full)
    part = [k for k in divs if k * W <= 128]
    return max(part) if part else 1


def _make_folded_kernel(eps, inv_w):
    """Row tile (R, L) with L = k*W lane-folded rows; segment matrices m1/m2."""
    def kernel(x_ref, gb_ref, m1_ref, m2_ref, o_ref):
        x = x_ref[...].astype(jnp.float32)                      # (R, L)
        g = gb_ref[:, 0:1]                                      # (R, 1) f32
        b = gb_ref[:, 1:2]                                      # (R, 1) f32
        # Per-original-row sum of squares via the (idle) MXU; exact to ~f32.
        ssum = jnp.dot(x * x, m1_ref[...],
                       preferred_element_type=jnp.float32,
                       precision=jax.lax.Precision.HIGHEST)     # (R, k)
        inv = jax.lax.rsqrt(ssum * inv_w + eps)                 # (R, k)
        # Broadcast gamma*invRMS back across each W-lane segment (MXU again).
        scale = jnp.dot(g * inv, m2_ref[...],
                        preferred_element_type=jnp.float32,
                        precision=jax.lax.Precision.HIGHEST)    # (R, L)
        o_ref[...] = (x * scale + b).astype(o_ref.dtype)
    return kernel


def _make_plain_kernel(eps):
    """Row tile (R, W): W >= 128 (or unfoldable) -> plain keepdim mean."""
    def kernel(x_ref, gb_ref, o_ref):
        x = x_ref[...].astype(jnp.float32)                      # (R, W)
        g = gb_ref[:, 0:1]
        b = gb_ref[:, 1:2]
        ms = jnp.mean(x * x, axis=-1, keepdims=True)            # (R, 1)
        o_ref[...] = (x * (g * jax.lax.rsqrt(ms + eps)) + b).astype(o_ref.dtype)
    return kernel


def rmsfilm(x, t, wg, bg, wb, bb, *, eps=1e-6, target_block_bytes=None):
    """x: (B, C, H, W); t: (B, d_t); wg/wb: (d_t, C); bg/bb: (C,).
    Matches PyTorch RMSFiLM.forward (NCHW, RMS over W with keepdim)."""
    B, C, H, W = x.shape
    out_dtype = x.dtype
    in_item = jnp.dtype(x.dtype).itemsize
    out_item = in_item
    eps = float(eps)
    if target_block_bytes is None:
        target_block_bytes = _default_block_bytes()

    # FiLM parameters: one small XLA matmul for the whole batch (hoisted).
    g = (t @ wg + bg).astype(jnp.float32)                       # (B, C)
    b = (t @ wb + bb).astype(jnp.float32)                       # (B, C)

    # Lane folding: rows of the kernel view are (b, c, h//k); lanes are k*W.
    k = _fold_factor(H, W)
    Hp = H // k
    L = k * W
    nrows = B * C * Hp

    x2 = x.reshape(nrows, L)                                    # free reshape
    gb = jnp.stack([g, b], axis=-1)                             # (B, C, 2)
    gb = jnp.broadcast_to(gb[:, :, None, :], (B, C, Hp, 2)).reshape(nrows, 2)

    # ---- row-block sizing -------------------------------------------------
    sub = 8 * max(1, 4 // in_item)        # 8 (f32) / 16 (bf16) / 32 (8-bit)
    Lpad = _round_up(L, 128)
    m_bytes = (2 * L * k * 4) if k > 1 else 0
    per_row_vmem = Lpad * (in_item + out_item) + 128 * 4        # x + out + gb

    vmem_cap = 48 << 20                   # safe on v7x (64 MiB physical VMEM)
    r_cap = max(sub, ((vmem_cap - m_bytes - (4 << 20)) // (2 * per_row_vmem))
                // sub * sub)
    r = max(sub, (target_block_bytes // max(L * in_item, 1)) // sub * sub)
    r = min(r, r_cap)
    # Keep >= ~4 grid steps when possible: pipeline ramp + v7x megacore split.
    if nrows > sub:
        r = min(r, max(sub, _round_up(pl.cdiv(nrows, 4), sub)))
    if r >= nrows:
        r = nrows                          # full dim is always a legal block
    grid = (pl.cdiv(nrows, r),)

    vmem_limit = 2 * _round_up(r, sub) * per_row_vmem + m_bytes + (4 << 20)
    vmem_limit = int(min(max(vmem_limit, 16 << 20), 64 << 20))

    row_spec = pl.BlockSpec((r, L), lambda i: (i, 0))
    gb_spec = pl.BlockSpec((r, 2), lambda i: (i, 0))
    common = dict(
        out_shape=jax.ShapeDtypeStruct((nrows, L), out_dtype),
        compiler_params=pltpu.CompilerParams(
            dimension_semantics=("parallel",),
            vmem_limit_bytes=vmem_limit,
        ),
    )

    if k > 1:
        # Constant segment matrices (resident in VMEM; fetched once per core).
        lane_seg = jnp.arange(L, dtype=jnp.int32) // W          # (L,)
        seg_ids = jnp.arange(k, dtype=jnp.int32)                # (k,)
        m1 = (lane_seg[:, None] == seg_ids[None, :]).astype(jnp.float32)  # (L,k)
        m2 = m1.T                                               # (k, L)
        out2 = pl.pallas_call(
            _make_folded_kernel(eps, 1.0 / W),
            grid_spec=pltpu.PrefetchScalarGridSpec(
                num_scalar_prefetch=0,
                grid=grid,
                in_specs=[
                    row_spec,                                   # x rows
                    gb_spec,                                    # fused gamma/beta
                    pl.BlockSpec((L, k), lambda i: (0, 0)),     # segment-sum mat
                    pl.BlockSpec((k, L), lambda i: (0, 0)),     # segment-bcast mat
                ],
                out_specs=row_spec,
            ),
            **common,
        )(x2, gb, m1, m2)
    else:
        out2 = pl.pallas_call(
            _make_plain_kernel(eps),
            grid_spec=pltpu.PrefetchScalarGridSpec(
                num_scalar_prefetch=0,
                grid=grid,
                in_specs=[row_spec, gb_spec],
                out_specs=row_spec,
            ),
            **common,
        )(x2, gb)

    return out2.reshape(B, C, H, W)


def rmsfilm_reference(x, t, wg, bg, wb, bb, *, eps=1e-6):
    B, C, H, W = x.shape
    g = (t @ wg + bg).reshape(B, C, 1, 1)
    b = (t @ wb + bb).reshape(B, C, 1, 1)
    ms = jnp.mean(x * x, axis=-1, keepdims=True)
    return g * x * jax.lax.rsqrt(ms + eps) + b


def _run_case(key, B, C, H, W, d_t):
    kx, kt, kwg, kbg, kwb, kbb = jax.random.split(key, 6)
    x = jax.random.normal(kx, (B, C, H, W), dtype=jnp.float32)
    t = jax.random.normal(kt, (B, d_t), dtype=jnp.float32)
    # PyTorch nn.Linear(d_t, d_model) stores weight (d_model, d_t); we keep the
    # transposed (d_t, d_model) layout so the wrapper computes t @ W + b.
    scale = 1.0 / jnp.sqrt(jnp.float32(d_t))
    wg = jax.random.uniform(kwg, (d_t, C), jnp.float32, -scale, scale)
    bg = jax.random.uniform(kbg, (C,), jnp.float32, -scale, scale)
    wb = jax.random.uniform(kwb, (d_t, C), jnp.float32, -scale, scale)
    bb = jax.random.uniform(kbb, (C,), jnp.float32, -scale, scale)

    out = jax.block_until_ready(rmsfilm(x, t, wg, bg, wb, bb, eps=1e-6))
    ref = rmsfilm_reference(x, t, wg, bg, wb, bb, eps=1e-6)
    assert out.shape == (B, C, H, W)
    assert jnp.allclose(out, ref, atol=1e-5, rtol=1e-5), "mismatch vs reference"


if __name__ == "__main__":
    key = jax.random.PRNGKey(0)
    k1, k2 = jax.random.split(key, 2)

    # Case 1 (spec shapes): W=16 < 128 -> full lane fold (L=256, rows == channels).
    _run_case(k1, B=2, C=4, H=16, W=16, d_t=8)

    # Case 2: W=128 (lane-dense, no fold) with a non-divisible row count to
    # exercise the cdiv grid / clipped partial last block.
    _run_case(k2, B=2, C=5, H=8, W=128, d_t=8)

    print("KERNEL_OK")
</pallas_src>

<mosaic_0001>
module attributes {stable_mosaic.version = 11 : i64} {
  func.func @kernel(%arg0: i32, %arg1: memref<8x256xf32, #tpu.memory_space<vmem>>, %arg2: memref<8x2xf32, #tpu.memory_space<vmem>>, %arg3: memref<256x16xf32, #tpu.memory_space<vmem>>, %arg4: memref<16x256xf32, #tpu.memory_space<vmem>>, %arg5: memref<8x256xf32, #tpu.memory_space<vmem>>) attributes {dimension_semantics = [#tpu.dimension_semantics<parallel>], iteration_bounds = array<i64: 1>, scalar_prefetch = 0 : i64, scratch_operands = 0 : i64, tpu.core_type = #tpu.core_type<tc>, window_params = [{transform_indices = @transform_0, window_bounds = array<i64: 8, 256>}, {transform_indices = @transform_1, window_bounds = array<i64: 8, 2>}, {pipeline_mode = #tpu.pipeline_mode<synchronous>, transform_indices = @transform_2, window_bounds = array<i64: 256, 16>}, {pipeline_mode = #tpu.pipeline_mode<synchronous>, transform_indices = @transform_3, window_bounds = array<i64: 16, 256>}, {transform_indices = @transform_4, window_bounds = array<i64: 8, 256>}]} {
    %c0 = arith.constant 0 : index
    %c0_0 = arith.constant 0 : index
    %0 = vector.load %arg1[%c0, %c0_0] : memref<8x256xf32, #tpu.memory_space<vmem>>, vector<8x256xf32>
    %c0_1 = arith.constant 0 : index
    %c0_2 = arith.constant 0 : index
    %1 = vector.load %arg2[%c0_1, %c0_2] : memref<8x2xf32, #tpu.memory_space<vmem>>, vector<8x1xf32>
    %c0_3 = arith.constant 0 : index
    %c1 = arith.constant 1 : index
    %2 = vector.load %arg2[%c0_3, %c1] : memref<8x2xf32, #tpu.memory_space<vmem>>, vector<8x1xf32>
    %3 = arith.mulf %0, %0 : vector<8x256xf32>
    %c0_4 = arith.constant 0 : index
    %c0_5 = arith.constant 0 : index
    %4 = vector.load %arg3[%c0_4, %c0_5] : memref<256x16xf32, #tpu.memory_space<vmem>>, vector<256x16xf32>
    %cst = arith.constant dense<0.000000e+00> : vector<8x16xf32>
    %5 = tpu.matmul %3, %4, %cst {dimension_numbers = #tpu.dot_dimension_numbers<[1], [0], [0], [1], [0, 0, 1, 1], [], []>, precision = #tpu.contract_precision<fp32>} : vector<8x256xf32>, vector<256x16xf32>, vector<8x16xf32> -> vector<8x16xf32>
    %cst_6 = arith.constant 6.250000e-02 : f32
    %6 = vector.broadcast %cst_6 : f32 to vector<8x16xf32>
    %7 = arith.mulf %5, %6 : vector<8x16xf32>
    %cst_7 = arith.constant 9.99999997E-7 : f32
    %8 = vector.broadcast %cst_7 : f32 to vector<8x16xf32>
    %9 = arith.addf %7, %8 : vector<8x16xf32>
    %10 = math.rsqrt %9 : vector<8x16xf32>
    %11 = vector.broadcast %1 : vector<8x1xf32> to vector<8x16xf32>
    %12 = arith.mulf %11, %10 : vector<8x16xf32>
    %c0_8 = arith.constant 0 : index
    %c0_9 = arith.constant 0 : index
    %13 = vector.load %arg4[%c0_8, %c0_9] : memref<16x256xf32, #tpu.memory_space<vmem>>, vector<16x256xf32>
    %cst_10 = arith.constant dense<0.000000e+00> : vector<8x256xf32>
    %14 = tpu.matmul %12, %13, %cst_10 {dimension_numbers = #tpu.dot_dimension_numbers<[1], [0], [0], [1], [0, 0, 1, 1], [], []>, precision = #tpu.contract_precision<fp32>} : vector<8x16xf32>, vector<16x256xf32>, vector<8x256xf32> -> vector<8x256xf32>
    %15 = arith.mulf %0, %14 : vector<8x256xf32>
    %16 = vector.broadcast %2 : vector<8x1xf32> to vector<8x256xf32>
    %17 = arith.addf %15, %16 : vector<8x256xf32>
    %c0_11 = arith.constant 0 : index
    %c0_12 = arith.constant 0 : index
    %18 = vector.load %arg5[%c0_11, %c0_12] : memref<8x256xf32, #tpu.memory_space<vmem>>, vector<8x256xf32>
    tpu.vector_store %arg5[%c0_11, %c0_12], %17 {strides = array<i32>} : memref<8x256xf32, #tpu.memory_space<vmem>>, vector<8x256xf32>,
    return
  }
  func.func @transform_0(%arg0: i32) -> (i32, i32) {
    %c0_i32 = arith.constant 0 : i32
    %c0_i32_0 = arith.constant 0 : i32
    return %arg0, %c0_i32 : i32, i32
  }
  func.func @transform_1(%arg0: i32) -> (i32, i32) {
    %c0_i32 = arith.constant 0 : i32
    %c0_i32_0 = arith.constant 0 : i32
    return %arg0, %c0_i32 : i32, i32
  }
  func.func @transform_2(%arg0: i32) -> (i32, i32) {
    %c0_i32 = arith.constant 0 : i32
    %c0_i32_0 = arith.constant 0 : i32
    %c0_i32_1 = arith.constant 0 : i32
    return %c0_i32, %c0_i32_0 : i32, i32
  }
  func.func @transform_3(%arg0: i32) -> (i32, i32) {
    %c0_i32 = arith.constant 0 : i32
    %c0_i32_0 = arith.constant 0 : i32
    %c0_i32_1 = arith.constant 0 : i32
    return %c0_i32, %c0_i32_0 : i32, i32
  }
  func.func @transform_4(%arg0: i32) -> (i32, i32) {
    %c0_i32 = arith.constant 0 : i32
    %c0_i32_0 = arith.constant 0 : i32
    return %arg0, %c0_i32 : i32, i32
  }
}

</mosaic_0001>

<bundles_post_ra>
// kernel: tpu_custom_call.1
= control target key start
LH: loop header
LB: loop body
LE: loop exit
PB: predicated region body
PF: predicated region fallthrough
CT: control target
= control target key end

     0   :  { %s1808_s0 = inlined_call_operand.vmem [shape: f32[8,256], index: 0, kind: input, shape index: {}]   ;;  %s1809_s1 = inlined_call_operand.vmem [shape: f32[8,2], index: 1, kind: input, shape index: {}]   ;;  %s1810_s2 = inlined_call_operand.vmem [shape: f32[256,16], index: 2, kind: input, shape index: {}]   ;;  %s1811_s3 = inlined_call_operand.vmem [shape: f32[16,256], index: 3, kind: input, shape index: {}]   ;;  %s1812_s4 = inlined_call_operand.hbm [shape: f32[8,256], index: 4, kind: output, shape index: {}]  }
   0x1   :  { %v38_v0 = vld [vmem:[%s1810_s2 + $0x78] sm:$0xff]  ;;  %v37_v1 = vld [vmem:[%s1810_s2 + $0x70] sm:$0xff]  ;;  %v36_v2 = vld [vmem:[%s1810_s2 + $0x68] sm:$0xff] }
   0x2   :  { %v1177_v3 = vand.u32 4294901760, %v38_v0  ;;  %v1179_v4 = vand.u32 4294901760, %v37_v1  ;;  %v1181_v5 = vand.u32 4294901760, %v36_v2  ;;  %v35_v6 = vld [vmem:[%s1810_s2 + $0x60] sm:$0xff]  ;;  %v34_v7 = vld [vmem:[%s1810_s2 + $0x58] sm:$0xff]  ;;  %v33_v8 = vld [vmem:[%s1810_s2 + $0x50] sm:$0xff] }
   0x3   :  { %v1192_v9 = vand.u32 4294901760, %v35_v6  ;;  %v1194_v10 = vand.u32 4294901760, %v34_v7  ;;  %v1196_v11 = vand.u32 4294901760, %v33_v8  ;;  %v32_v12 = vld [vmem:[%s1810_s2 + $0x48] sm:$0xff]  ;;  %v31_v13 = vld [vmem:[%s1810_s2 + $0x40] sm:$0xff]  ;;  %v30_v18 = vld [vmem:[%s1810_s2 + $0x38] sm:$0xff] }
   0x4   :  { %56 = vmatpush.msra.mxu0 %v1177_v3  ;;  %v1206_v14 = vsub.f32 %v38_v0, %v1177_v3  ;;  %v1209_v15 = vsub.f32 %v37_v1, %v1179_v4  ;;  %252 = vmatpush.msra.mxu3 %v1177_v3  ;;  %v1213_v16 = vsub.f32 %v36_v2, %v1181_v5  ;;  %v1215_v17 = vand.u32 4294901760, %v32_v12  ;;  %v29_v26 = vld [vmem:[%s1810_s2 + $0x30] sm:$0xff]  ;;  %v28_v34 = vld [vmem:[%s1810_s2 + $0x28] sm:$0xff] }
   0x5   :  { %v1221_v19 = vsub.f32 %v35_v6, %v1192_v9  ;;  %v1224_v20 = vsub.f32 %v34_v7, %v1194_v10  ;;  %v1226_v21 = vand.u32 4294901760, %v31_v13  ;;  %v1234_v25 = vsub.f32 %v33_v8, %v1196_v11 }
   0x6   :  { %58 = vmatpush.msra.mxu0 %v1179_v4  ;;  %199 = vmatpush.msra.mxu2 %v1206_v14  ;;  %v98_v22 = vand.u32 4294901760, %v1206_v14  ;;  %v1829_v23 = vand.u32 4294901760, %v1209_v15  ;;  %v1826_v24 = vand.u32 4294901760, %v1213_v16  ;;  %v1241_v28 = vand.u32 4294901760, %v30_v18 }
   0x7   :  { %254 = vmatpush.msra.mxu3 %v1179_v4  ;;  %v1825_v27 = vand.u32 4294901760, %v1221_v19  ;;  %v1244_v29 = vsub.f32 %v32_v12, %v1215_v17  ;;  %v1822_v33 = vand.u32 4294901760, %v1224_v20 }
   0x8   :  { %60 = vmatpush.msra.mxu0 %v1181_v5  ;;  %202 = vmatpush.msra.mxu2 %v1209_v15  ;;  %v99_v30 = vsub.f32 %v1206_v14, %v98_v22  ;;  %v105_v31 = vsub.f32 %v1209_v15, %v1829_v23  ;;  %v111_v32 = vsub.f32 %v1213_v16, %v1826_v24 }
   0x9   :  { %9 = vsyncpa [#allocation3], 0  ;;  %256 = vmatpush.msra.mxu3 %v1181_v5  ;;  %v1262_v35 = vand.u32 4294901760, %v29_v26  ;;  %v1265_v36 = vsub.f32 %v31_v13, %v1226_v21  ;;  %v117_v39 = vsub.f32 %v1221_v19, %v1825_v27  ;;  %v1821_v40 = vand.u32 4294901760, %v1234_v25  ;;  %v27_v42 = vld [vmem:[%s1810_s2 + $0x20] sm:$0xff]  ;;  %v26_v48 = vld [vmem:[%s1810_s2 + $0x18] sm:$0xff] }
   0xa   :  { %62 = vmatpush.msra.mxu0 %v1192_v9  ;;  %v100_v37 = vand.u32 4294901760, %v99_v30  ;;  %205 = vmatpush.msra.mxu2 %v1213_v16  ;;  %v106_v38 = vand.u32 4294901760, %v105_v31  ;;  %v1274_v41 = vand.u32 4294901760, %v28_v34  ;;  %v112_v43 = vand.u32 4294901760, %v111_v32  ;;  %v25_v54 = vld [vmem:[%s1810_s2 + $0x10] sm:$0xff]  ;;  %v54_v59 = vld [vmem:[%s1810_s2 + $0xf8] sm:$0xff] }
   0xb   :  { %258 = vmatpush.msra.mxu3 %v1192_v9  ;;  %v123_v44 = vsub.f32 %v1224_v20, %v1822_v33  ;;  %v1819_v45 = vand.u32 4294901760, %v1244_v29  ;;  %v1285_v46 = vsub.f32 %v30_v18, %v1241_v28  ;;  %v1818_v47 = vand.u32 4294901760, %v1265_v36  ;;  %v24_v61 = vld [vmem:[%s1810_s2 + $0x8] sm:$0xff]  ;;  %v53_v2 = vld [vmem:[%s1810_s2 + $0xf0] sm:$0xff]  ;;  %v23_v7 = vld [vmem:[%s1810_s2] sm:$0xff]  ;;  %s1098_s15 = sshll.u32 %s1812_s4, 4  ;;  %s1099_s15 = int_to_ptr.hbm [resolvable:$true] %s1098_s15 }
   0xc   :  { %64 = vmatpush.msra.mxu0 %v1194_v10  ;;  %101 = vmatpush.msra.mxu1 %v100_v37  ;;  %v118_v49 = vand.u32 4294901760, %v117_v39  ;;  %v129_v50 = vsub.f32 %v1234_v25, %v1821_v40  ;;  %v1297_v51 = vand.u32 4294901760, %v27_v42  ;;  %v1300_v52 = vsub.f32 %v29_v26, %v1262_v35  ;;  %v52_v32 = vld [vmem:[%s1810_s2 + $0xe8] sm:$0xff] }
   0xd   :  { %208 = vmatpush.msra.mxu2 %v1221_v19  ;;  %260 = vmatpush.msra.mxu3 %v1194_v10  ;;  %v1305_v53 = vsub.f32 %v28_v34, %v1274_v41  ;;  %v124_v55 = vand.u32 4294901760, %v123_v44  ;;  %v135_v56 = vsub.f32 %v1244_v29, %v1819_v45  ;;  %v1314_v57 = vand.u32 4294901760, %v26_v48 }
   0xe   :  { %66 = vmatpush.msra.mxu0 %v1196_v11  ;;  %107 = vmatpush.msra.mxu1 %v106_v38  ;;  %v1817_v58 = vand.u32 4294901760, %v1285_v46  ;;  %v141_v60 = vsub.f32 %v1265_v36, %v1818_v47  ;;  %v130_v62 = vand.u32 4294901760, %v129_v50  ;;  %v1329_v63 = vand.u32 4294901760, %v25_v54 }
   0xf   :  { %211 = vmatpush.msra.mxu2 %v1224_v20  ;;  %262 = vmatpush.msra.mxu3 %v1196_v11  ;;  %v1815_v0 = vand.u32 4294901760, %v1300_v52  ;;  %v1333_v1 = vsub.f32 %v27_v42, %v1297_v51  ;;  %v1814_v6 = vand.u32 4294901760, %v1305_v53  ;;  %v1344_v8 = vand.u32 4294901760, %v54_v59  ;;  %v51_v42 = vld [vmem:[%s1810_s2 + $0xe0] sm:$0xff] }
  0x10   :  { %68 = vmatpush.msra.mxu0 %v1215_v17  ;;  %113 = vmatpush.msra.mxu1 %v112_v43  ;;  %v136_v12 = vand.u32 4294901760, %v135_v56  ;;  %v147_v13 = vsub.f32 %v1285_v46, %v1817_v58  ;;  %v1350_v18 = vand.u32 4294901760, %v24_v61  ;;  %v1353_v26 = vsub.f32 %v26_v48, %v1314_v57 }
  0x11   :  { %214 = vmatpush.msra.mxu2 %v1234_v25  ;;  %264 = vmatpush.msra.mxu3 %v1215_v17  ;;  %v142_v30 = vand.u32 4294901760, %v141_v60  ;;  %v1357_v31 = vand.u32 4294901760, %v53_v2  ;;  %v153_v34 = vsub.f32 %v1300_v52, %v1815_v0  ;;  %v1366_v37 = vand.u32 4294901760, %v23_v7 }
  0x12   :  { %70 = vmatpush.msra.mxu0 %v1226_v21  ;;  %119 = vmatpush.msra.mxu1 %v118_v49  ;;  %v1813_v38 = vand.u32 4294901760, %v1333_v1  ;;  %v1370_v39 = vsub.f32 %v25_v54, %v1329_v63  ;;  %v159_v43 = vsub.f32 %v1305_v53, %v1814_v6  ;;  %v1381_v44 = vsub.f32 %v54_v59, %v1344_v8  ;;  %v50_v59 = vld [vmem:[%s1810_s2 + $0xd8] sm:$0xff]  ;;  %v48_v6 = vld [vmem:[%s1810_s2 + $0xc8] sm:$0xff] }
  0x13   :  { %217 = vmatpush.msra.mxu2 %v1244_v29  ;;  %266 = vmatpush.msra.mxu3 %v1226_v21  ;;  %1837 = vst [vmem:[#allocation5_spill] sm:$0xff] %v1366_v37  ;;  %v148_v48 = vand.u32 4294901760, %v147_v13  ;;  %v1816_v49 = vand.u32 4294901760, %v1353_v26  ;;  %v1386_v50 = vsub.f32 %v24_v61, %v1350_v18  ;;  %v1388_v54 = vand.u32 4294901760, %v52_v32 }
  0x14   :  { %72 = vmatpush.msra.mxu0 %v1241_v28  ;;  %125 = vmatpush.msra.mxu1 %v124_v55  ;;  %v1393_v55 = vsub.f32 %v53_v2, %v1357_v31  ;;  %v1395_v56 = vand.u32 4294901760, %v51_v42  ;;  %v154_v60 = vand.u32 4294901760, %v153_v34  ;;  %v165_v61 = vsub.f32 %v1333_v1, %v1813_v38 }
  0x15   :  { %220 = vmatpush.msra.mxu2 %v1265_v36  ;;  %268 = vmatpush.msra.mxu3 %v1241_v28  ;;  %1838 = vst [vmem:[#allocation6_spill] sm:$0xff] %v1388_v54  ;;  %v160_v2 = vand.u32 4294901760, %v159_v43  ;;  %v1823_v13 = vand.u32 4294901760, %v1381_v44  ;;  %v171_v34 = vsub.f32 %v1353_v26, %v1816_v49  ;;  %v1420_v38 = vsub.f32 %v52_v32, %v1388_v54 }
  0x16   :  { %74 = vmatpush.msra.mxu0 %v1262_v35  ;;  %131 = vmatpush.msra.mxu1 %v130_v62  ;;  %v1820_v62 = vand.u32 4294901760, %v1370_v39  ;;  %v1422_v43 = vand.u32 4294901760, %v50_v59  ;;  %v1431_v0 = vsub.f32 %v51_v42, %v1395_v56  ;;  %v166_v32 = vand.u32 4294901760, %v165_v61 }
  0x17   :  { %223 = vmatpush.msra.mxu2 %v1285_v46  ;;  %270 = vmatpush.msra.mxu3 %v1262_v35  ;;  %v440_v42 = vsub.f32 %v1381_v44, %v1823_v13  ;;  %v1445_v45 = vand.u32 4294901760, %v48_v6  ;;  %v172_v61 = vand.u32 4294901760, %v171_v34  ;;  %v1830_v40 = vand.u32 4294901760, %v1420_v38  ;;  %v46_v34 = vld [vmem:[%s1810_s2 + $0xb8] sm:$0xff] }
  0x18   :  { %76 = vmatpush.msra.mxu0 %v1274_v41  ;;  %137 = vmatpush.msra.mxu1 %v136_v12  ;;  %v1406_v12 = vsub.f32 %v23_v7, %v1366_v37  ;;  %v1824_v7 = vand.u32 4294901760, %v1386_v50  ;;  %v177_v49 = vsub.f32 %v1370_v39, %v1820_v62  ;;  %v1456_v33 = vsub.f32 %v50_v59, %v1422_v43 }
  0x19   :  { %226 = vmatpush.msra.mxu2 %v1300_v52  ;;  %272 = vmatpush.msra.mxu3 %v1274_v41  ;;  %v1490_v23 = vand.u32 4294901760, %v46_v34  ;;  %v1839_v14 = vand.u32 4294901760, %v1209_v15  ;;  %vm759_vm3 = vcmask 130048  }
  0x1a   :  { %78 = vmatpush.msra.mxu0 %v1297_v51  ;;  %143 = vmatpush.msra.mxu1 %v142_v30  ;;  %v49_v30 = vld [vmem:[%s1810_s2 + $0xd0] sm:$0xff]  ;;  %v1828_v58 = vand.u32 4294901760, %v1406_v12  ;;  %v183_v62 = vsub.f32 %v1386_v50, %v1824_v7  ;;  %v178_v7 = vand.u32 4294901760, %v177_v49  ;;  %v1483_v49 = vsub.f32 %v48_v6, %v1445_v45 }
  0x1b   :  { %229 = vmatpush.msra.mxu2 %v1305_v53  ;;  %274 = vmatpush.msra.mxu3 %v1297_v51  ;;  %v1438_v47 = vand.u32 4294901760, %v49_v30  ;;  %v1840_v6 = vand.u32 4294901760, %v1431_v0 }
  0x1c   :  { %80 = vmatpush.msra.mxu0 %v1314_v57  ;;  %149 = vmatpush.msra.mxu1 %v148_v48  ;;  %v1827_v48 = vand.u32 4294901760, %v1393_v55  ;;  %v189_v59 = vsub.f32 %v1406_v12, %v1828_v58  ;;  %v184_v58 = vand.u32 4294901760, %v183_v62 }
  0x1d   :  { %232 = vmatpush.msra.mxu2 %v1333_v1  ;;  %276 = vmatpush.msra.mxu3 %v1314_v57  ;;  %v1472_v27 = vsub.f32 %v49_v30, %v1438_v47  ;;  %v452_v30 = vsub.f32 %v1420_v38, %v1830_v40  ;;  %v458_v62 = vsub.f32 %v1431_v0, %v1840_v6  ;;  %v1843_v6 = vand.u32 4294901760, %v1221_v19 }
  0x1e   :  { %82 = vmatpush.msra.mxu0 %v1329_v63  ;;  %155 = vmatpush.msra.mxu1 %v154_v60  ;;  %v47_v60 = vld [vmem:[%s1810_s2 + $0xc0] sm:$0xff]  ;;  %v446_v13 = vsub.f32 %v1393_v55, %v1827_v48  ;;  %v45_v48 = vld [vmem:[%s1810_s2 + $0xb0] sm:$0xff]  ;;  %v190_v40 = vand.u32 4294901760, %v189_v59  ;;  %v1842_v59 = vand.u32 4294901760, %v1456_v33 }
  0x1f   :  { %235 = vmatpush.msra.mxu2 %v1353_v26  ;;  %278 = vmatpush.msra.mxu3 %v1329_v63  ;;  %v1474_v24 = vand.u32 4294901760, %v47_v60  ;;  %v459_v15 = vand.u32 4294901760, %v458_v62 }
  0x20   :  { %84 = vmatpush.msra.mxu0 %v1350_v18  ;;  %161 = vmatpush.msra.mxu1 %v160_v2  ;;  %v43_v2 = vld [vmem:[%s1810_s2 + $0xa0] sm:$0xff] }
  0x21   :  { %238 = vmatpush.msra.mxu2 %v1370_v39  ;;  %280 = vmatpush.msra.mxu3 %v1350_v18  ;;  %v1541_v19 = vand.u32 4294901760, %v43_v2 }
  0x22   :  { %86 = vmatpush.msra.mxu0 %v1366_v37  ;;  %167 = vmatpush.msra.mxu1 %v166_v32  ;;  %v441_v32 = vand.u32 4294901760, %v440_v42  ;;  %v1498_v42 = vand.u32 4294901760, %v45_v48 }
  0x23   :  { %241 = vmatpush.msra.mxu2 %v1386_v50  ;;  %282 = vmatpush.msra.mxu3 %v1366_v37 }
  0x24   :  { %293 = vmatpush.msrb.mxu0 %v98_v22  ;;  %173 = vmatpush.msra.mxu1 %v172_v61  ;;  %v447_v22 = vand.u32 4294901760, %v446_v13  ;;  %v44_v61 = vld [vmem:[%s1810_s2 + $0xa8] sm:$0xff]  ;;  %v1841_v13 = vand.u32 4294901760, %v1213_v16  ;;  %v464_v16 = vsub.f32 %v1456_v33, %v1842_v59  ;;  %v1531_v37 = vsub.f32 %v45_v48, %v1498_v42 }
  0x25   :  { %244 = vmatpush.msra.mxu2 %v1406_v12  ;;  %442 = vmatpush.msrb.mxu3 %v441_v32  ;;  %v1524_v32 = vsub.f32 %v46_v34, %v1490_v23  ;;  %v1844_v34 = vand.u32 4294901760, %v1472_v27  ;;  %v1845_v48 = vand.u32 4294901760, %v1224_v20  ;;  %v1847_v20 = vand.u32 4294901760, %v1234_v25 }
  0x26   :  { %297 = vmatpush.msrb.mxu0 %v1839_v14  ;;  %179 = vmatpush.msra.mxu1 %v178_v7  ;;  %v1506_v14 = vsub.f32 %v47_v60, %v1474_v24  ;;  %v1517_v7 = vld [vmem:[%s1808_s0] sm:$0xff]  ;;  %v453_v60 = vand.u32 4294901760, %v452_v30 }
  0x27   :  { %397 = vmatpush.msrb.mxu2 %v1344_v8  ;;  %448 = vmatpush.msrb.mxu3 %v447_v22  ;;  %v470_v30 = vsub.f32 %v1472_v27, %v1844_v34  ;;  %v21_v22 = vmul.f32 %v1517_v7, %v1517_v7  ;;  %v1834_v34 = vand.u32 4294901760, %v1524_v32 }
  0x28   :  { %301 = vmatpush.msrb.mxu0 %v1841_v13  ;;  %185 = vmatpush.msra.mxu1 %v184_v58  ;;  %v1526_v13 = vand.u32 4294901760, %v44_v61  ;;  %v42_v58 = vld [vmem:[%s1810_s2 + $0x98] sm:$0xff] }
  0x29   :  { %399 = vmatpush.msrb.mxu2 %v1357_v31  ;;  %454 = vmatpush.msrb.mxu3 %v453_v60  ;;  %v471_v60 = vand.u32 4294901760, %v470_v30  ;;  %v1572_v25 = vand.u32 4294901760, %v21_v22 }
  0x2a   :  { %305 = vmatpush.msrb.mxu0 %v1843_v6  ;;  %191 = vmatpush.msra.mxu1 %v190_v40  ;;  %v1846_v40 = vand.u32 4294901760, %v1483_v49  ;;  %v465_v6 = vand.u32 4294901760, %v464_v16  ;;  %v1554_v59 = vsub.f32 %v44_v61, %v1526_v13  ;;  %v1848_v61 = vand.u32 4294901760, %v1506_v14 }
  0x2b   :  { %401 = vmatpush.msrb.mxu2 %v1388_v54  ;;  %v1556_v54 = vand.u32 4294901760, %v42_v58  ;;  %460 = vmatpush.msrb.mxu3 %v459_v15  ;;  %v40_v15 = vld [vmem:[%s1810_s2 + $0x88] sm:$0xff] }
  0x2c   :  { %309 = vmatpush.msrb.mxu0 %v1845_v48  ;;  %360 = vmatpush.msrb.mxu1 %v1177_v3  ;;  %v476_v62 = vsub.f32 %v1483_v49, %v1846_v40  ;;  %v1835_v3 = vand.u32 4294901760, %v1531_v37  ;;  %v41_v48 = vld [vmem:[%s1810_s2 + $0x90] sm:$0xff]  ;;  %v482_v16 = vsub.f32 %v1506_v14, %v1848_v61  ;;  %v1570_v40 = vsub.f32 %v43_v2, %v1541_v19 }
  0x2d   :  { %403 = vmatpush.msrb.mxu2 %v1395_v56  ;;  %466 = vmatpush.msrb.mxu3 %v465_v6  ;;  %v488_v2 = vsub.f32 %v1524_v32, %v1834_v34  ;;  %v499_v30 = vand.u32 4294901760, %v1554_v59  ;;  %v1585_v61 = vand.u32 4294901760, %v41_v48  ;;  %v1599_v34 = vsub.f32 %v21_v22, %v1572_v25 }
  0x2e   :  { %313 = vmatpush.msrb.mxu0 %v1847_v20  ;;  %362 = vmatpush.msrb.mxu1 %v1179_v4  ;;  %v1849_v4 = vand.u32 4294901760, %v1244_v29  ;;  %v477_v20 = vand.u32 4294901760, %v476_v62  ;;  %v1588_v29 = vsub.f32 %v42_v58, %v1556_v54  ;;  %v494_v62 = vsub.f32 %v1531_v37, %v1835_v3 }
  0x2f   :  { %405 = vmatpush.msrb.mxu2 %v1422_v43  ;;  %472 = vmatpush.msrb.mxu3 %v471_v60  ;;  %v483_v6 = vand.u32 4294901760, %v482_v16  ;;  %v1601_v58 = vand.u32 4294901760, %v40_v15  ;;  %v1612_v60 = vld [vmem:[%s1808_s0 + $0x8] sm:$0xff]  ;;  %v489_v22 = vand.u32 4294901760, %v488_v2  ;;  %v500_v16 = vsub.f32 %v1554_v59, %v499_v30 }
  0x30   :  { %317 = vmatpush.msrb.mxu0 %v1849_v4  ;;  %364 = vmatpush.msrb.mxu1 %v1181_v5  ;;  %v1850_v5 = vand.u32 4294901760, %v1265_v36  ;;  %v505_v4 = vand.u32 4294901760, %v1570_v40  ;;  %v39_v36 = vld [vmem:[%s1810_s2 + $0x80] sm:$0xff]  ;;  %v89_v2 = vand.u32 4294901760, %v1599_v34 }
  0x31   :  { %407 = vmatpush.msrb.mxu2 %v1438_v47  ;;  %478 = vmatpush.msrb.mxu3 %v477_v20  ;;  %v1625_v3 = vand.u32 4294901760, %v39_v36 }
  0x32   :  { %321 = vmatpush.msrb.mxu0 %v1850_v5  ;;  %366 = vmatpush.msrb.mxu1 %v1192_v9  ;;  %v1851_v9 = vand.u32 4294901760, %v1285_v46  ;;  %v1836_v5 = vand.u32 4294901760, %v1588_v29  ;;  %v1620_v46 = vsub.f32 %v41_v48, %v1585_v61  ;;  %v506_v20 = vsub.f32 %v1570_v40, %v505_v4 }
  0x33   :  { %409 = vmatpush.msrb.mxu2 %v1445_v45  ;;  %484 = vmatpush.msrb.mxu3 %v483_v6  ;;  %v1633_v48 = vsub.f32 %v40_v15, %v1601_v58  ;;  %v1854_v15 = vand.u32 4294901760, %v1333_v1 }
  0x34   :  { %325 = vmatpush.msrb.mxu0 %v1851_v9  ;;  %368 = vmatpush.msrb.mxu1 %v1194_v10  ;;  %v1852_v10 = vand.u32 4294901760, %v1300_v52  ;;  %v495_v9 = vand.u32 4294901760, %v494_v62  ;;  %v22_v52 = vmul.f32 %v1612_v60, %v1612_v60  ;;  %v501_v62 = vand.u32 4294901760, %v500_v16 }
  0x35   :  { %411 = vmatpush.msrb.mxu2 %v1474_v24  ;;  %490 = vmatpush.msrb.mxu3 %v489_v22  ;;  %v512_v6 = vsub.f32 %v1588_v29, %v1836_v5  ;;  %v90_v22 = vsub.f32 %v1599_v34, %v89_v2  ;;  %v523_v16 = vand.u32 4294901760, %v1633_v48  ;;  %v1855_v5 = vand.u32 4294901760, %v1353_v26 }
  0x36   :  { %329 = vmatpush.msrb.mxu0 %v1852_v10  ;;  %370 = vmatpush.msrb.mxu1 %v1196_v11  ;;  %v1853_v11 = vand.u32 4294901760, %v1305_v53  ;;  %v517_v10 = vand.u32 4294901760, %v1620_v46  ;;  %v1649_v53 = vsub.f32 %v39_v36, %v1625_v3  ;;  %v1856_v36 = vand.u32 4294901760, %v1370_v39 }
  0x37   :  { %413 = vmatpush.msrb.mxu2 %v1490_v23  ;;  %496 = vmatpush.msrb.mxu3 %v495_v9  ;;  %v91_v26 = vand.u32 4294901760, %v90_v22  ;;  %v1858_v39 = vand.u32 4294901760, %v1406_v12 }
  0x38   :  { %333 = vmatpush.msrb.mxu0 %v1853_v11  ;;  %372 = vmatpush.msrb.mxu1 %v1215_v17  ;;  %v507_v17 = vand.u32 4294901760, %v506_v20  ;;  %v1654_v11 = vand.u32 4294901760, %v22_v52  ;;  %v518_v1 = vsub.f32 %v1620_v46, %v517_v10  ;;  %v529_v9 = vand.u32 4294901760, %v1649_v53 }
  0x39   :  { %415 = vmatpush.msrb.mxu2 %v1498_v42  ;;  %502 = vmatpush.msrb.mxu3 %v501_v62  ;;  %v1857_v20 = vand.u32 4294901760, %v1386_v50 }
  0x3a   :  { %337 = vmatpush.msrb.mxu0 %v1854_v15  ;;  %374 = vmatpush.msrb.mxu1 %v1226_v21  ;;  %v513_v21 = vand.u32 4294901760, %v512_v6  ;;  %v530_v62 = vsub.f32 %v1649_v53, %v529_v9 }
  0x3b   :  { %417 = vmatpush.msrb.mxu2 %v1526_v13  ;;  %508 = vmatpush.msrb.mxu3 %v507_v17 }
  0x3c   :  { %341 = vmatpush.msrb.mxu0 %v1855_v5  ;;  %376 = vmatpush.msrb.mxu1 %v1241_v28  ;;  %v524_v28 = vsub.f32 %v1633_v48, %v523_v16  ;;  %v1672_v5 = vsub.f32 %v22_v52, %v1654_v11 }
  0x3d   :  { %419 = vmatpush.msrb.mxu2 %v1541_v19  ;;  %514 = vmatpush.msrb.mxu3 %v513_v21  ;;  %v758_v21 = vld [vmem:[%s1811_s3 + $0x18] sm:$0xff] }
  0x3e   :  { %345 = vmatpush.msrb.mxu0 %v1856_v36  ;;  %378 = vmatpush.msrb.mxu1 %v1262_v35  ;;  %v519_v35 = vand.u32 4294901760, %v518_v1  ;;  %v525_v50 = vand.u32 4294901760, %v524_v28  ;;  %v430_v52 = vand.u32 4294901760, %v1672_v5  ;;  %v936_v1 = vand.u32 4294901760, %v758_v21 }
  0x3f   :  { %421 = vmatpush.msrb.mxu2 %v1556_v54  ;;  %92 = vmatmul.f32.vlgmr.msra.gmra.mxu0 %v91_v26 }
  0x40   :  { %349 = vmatpush.msrb.mxu0 %v1857_v20  ;;  %380 = vmatpush.msrb.mxu1 %v1274_v41  ;;  %v531_v41 = vand.u32 4294901760, %v530_v62  ;;  %v964_v28 = vsub.f32 %v758_v21, %v936_v1 }
  0x41   :  { %423 = vmatpush.msrb.mxu2 %v1585_v61  ;;  %520 = vmatpush.msrb.mxu3 %v519_v35 }
  0x42   :  { %353 = vmatpush.msrb.mxu0 %v1858_v39  ;;  %382 = vmatpush.msrb.mxu1 %v1297_v51  ;;  %v431_v51 = vsub.f32 %v1672_v5, %v430_v52  ;;  %v965_v39 = vand.u32 4294901760, %v964_v28 }
  0x43   :  { %425 = vmatpush.msrb.mxu2 %v1601_v58  ;;  %526 = vmatpush.msrb.mxu3 %v525_v50 }
  0x44   :  { %540 = vmatpush.msra.mxu0 %v1381_v44  ;;  %384 = vmatpush.msrb.mxu1 %v1314_v57  ;;  %v1859_v57 = vand.u32 4294901760, %v1381_v44  ;;  %v432_v12 = vand.u32 4294901760, %v431_v51  ;;  %v1862_v44 = vand.u32 4294901760, %v1420_v38 }
  0x45   :  { %247 = vmatmul.f32.vlgmr.msra.gmra.mxu2 %v1599_v34  ;;  %286 = vmatmul.f32.vlgmr.msra.gmra.mxu3 %v89_v2  ;;  %v1861_v34 = vld [vmem:[#allocation5_spill] sm:$0xff] }
  0x46   :  { %543 = vmatpush.msra.mxu0 %v1393_v55  ;;  %386 = vmatpush.msrb.mxu1 %v1329_v63  ;;  %v1860_v63 = vand.u32 4294901760, %v1393_v55  ;;  %v1864_v55 = vld [vmem:[#allocation6_spill] sm:$0xff] }
  0x47   :  { %427 = vmatpush.msrb.mxu2 %v1625_v3  ;;  %532 = vmatpush.msrb.mxu3 %v531_v41 }
  0x48   :  { %546 = vmatpush.msra.mxu0 %v1420_v38  ;;  %388 = vmatpush.msrb.mxu1 %v1350_v18  ;;  %v1863_v18 = vand.u32 4294901760, %v1431_v0 }
  0x49   :  { %634 = vmatpush.msra.mxu2 %v1859_v57  ;;  %193 = vmatmul.f32.vlgmr.msra.gmra.mxu1 %v1572_v25 }
  0x4a   :  { %549 = vmatpush.msra.mxu0 %v1431_v0  ;;  %701 = vmatpush.msra.mxu3 %v1344_v8  ;;  %v1866_v0 = vand.u32 4294901760, %v1472_v27 }
  0x4b   :  { %638 = vmatpush.msra.mxu2 %v1860_v63  ;;  %390 = vmatpush.msrb.mxu1 %v1861_v34 }
  0x4c   :  { %552 = vmatpush.msra.mxu0 %v1456_v33  ;;  %703 = vmatpush.msra.mxu3 %v1357_v31 }
  0x4d   :  { %593 = vmatpush.msra.mxu1 %v1344_v8  ;;  %642 = vmatpush.msra.mxu2 %v1862_v44  ;;  %v1865_v8 = vand.u32 4294901760, %v1456_v33  ;;  %v1867_v33 = vand.u32 4294901760, %v1483_v49 }
  0x4e   :  { %433 = vmatmul.f32.vlgmr.msrb.gmra.mxu2 %v432_v12  ;;  %555 = vmatpush.msra.mxu0 %v1472_v27  ;;  %v1869_v27 = vand.u32 4294901760, %v1524_v32 }
  0x4f   :  { %595 = vmatpush.msra.mxu1 %v1357_v31  ;;  %646 = vmatpush.msra.mxu2 %v1863_v18  ;;  %v1868_v31 = vand.u32 4294901760, %v1506_v14 }
  0x50   :  { %705 = vmatpush.msra.mxu3 %v1864_v55  ;;  %355 = vmatmul.f32.vlgmr.msrb.gmra.mxu0 %v1572_v25 }
  0x51   :  { %534 = vmatmul.f32.vlgmr.msrb.gmra.mxu3 %v1654_v11  ;;  %558 = vmatpush.msra.mxu0 %v1483_v49 }
  0x52   :  { %597 = vmatpush.msra.mxu1 %v1864_v55  ;;  %650 = vmatpush.msra.mxu2 %v1865_v8 }
  0x53   :  { %707 = vmatpush.msra.mxu3 %v1395_v56  ;;  %392 = vmatmul.f32.vlgmr.msrb.gmra.mxu1 %v1572_v25  ;;  %v755_v25 = vld [vmem:[%s1811_s3] sm:$0xff] }
  0x54   :  { %561 = vmatpush.msra.mxu0 %v1506_v14  ;;  %599 = vmatpush.msra.mxu1 %v1395_v56 }
  0x55   :  { %654 = vmatpush.msra.mxu2 %v1866_v0  ;;  %709 = vmatpush.msra.mxu3 %v1422_v43 }
  0x56   :  { %564 = vmatpush.msra.mxu0 %v1524_v32  ;;  %601 = vmatpush.msra.mxu1 %v1422_v43 }
  0x57   :  { %658 = vmatpush.msra.mxu2 %v1867_v33  ;;  %711 = vmatpush.msra.mxu3 %v1438_v47 }
  0x58   :  { %567 = vmatpush.msra.mxu0 %v1531_v37  ;;  %603 = vmatpush.msra.mxu1 %v1438_v47  ;;  %v1870_v47 = vand.u32 4294901760, %v1531_v37 }
  0x59   :  { %662 = vmatpush.msra.mxu2 %v1868_v31  ;;  %713 = vmatpush.msra.mxu3 %v1445_v45  ;;  %v1141_v31 = vmov 1  }
  0x5a   :  { %570 = vmatpush.msra.mxu0 %v1554_v59  ;;  %605 = vmatpush.msra.mxu1 %v1445_v45  ;;  %v1777_v45 = vld [vmem:[%s1809_s1] sm:$0xff] }
  0x5b   :  { %666 = vmatpush.msra.mxu2 %v1869_v27  ;;  %715 = vmatpush.msra.mxu3 %v1474_v24 }
  0x5c   :  { %573 = vmatpush.msra.mxu0 %v1570_v40  ;;  %607 = vmatpush.msra.mxu1 %v1474_v24  ;;  %v1140_v24 = vmov 0  }
  0x5d   :  { %670 = vmatpush.msra.mxu2 %v1870_v47  ;;  %717 = vmatpush.msra.mxu3 %v1490_v23 }
  0x5e   :  { %576 = vmatpush.msra.mxu0 %v1588_v29  ;;  %609 = vmatpush.msra.mxu1 %v1490_v23  ;;  %v1871_v23 = vand.u32 4294901760, %v1588_v29 }
  0x5f   :  { %674 = vmatpush.msra.mxu2 %v499_v30  ;;  %719 = vmatpush.msra.mxu3 %v1498_v42 }
  0x60   :  { %579 = vmatpush.msra.mxu0 %v1620_v46  ;;  %611 = vmatpush.msra.mxu1 %v1498_v42 }
  0x61   :  { %678 = vmatpush.msra.mxu2 %v505_v4  ;;  %721 = vmatpush.msra.mxu3 %v1526_v13 }
  0x62   :  { %582 = vmatpush.msra.mxu0 %v1633_v48  ;;  %613 = vmatpush.msra.mxu1 %v1526_v13 }
  0x63   :  { %682 = vmatpush.msra.mxu2 %v1871_v23  ;;  %723 = vmatpush.msra.mxu3 %v1541_v19 }
  0x64   :  { %585 = vmatpush.msra.mxu0 %v1649_v53  ;;  %615 = vmatpush.msra.mxu1 %v1541_v19  ;;  %v757_v19 = vld [vmem:[%s1811_s3 + $0x10] sm:$0xff] }
  0x65   :  { %686 = vmatpush.msra.mxu2 %v517_v10  ;;  %725 = vmatpush.msra.mxu3 %v1556_v54 }
  0x66   :  { %588 = vmatmul.f32.vlgmr.msra.gmra.mxu0 %v1672_v5  ;;  %617 = vmatpush.msra.mxu1 %v1556_v54 }
  0x67   :  { %690 = vmatpush.msra.mxu2 %v523_v16  ;;  %727 = vmatpush.msra.mxu3 %v1585_v61 }
  0x68   :  { %619 = vmatpush.msra.mxu1 %v1585_v61  ;;  %1110 = vset.pattern.permute.xlu0 %v1140_v24  ;;  %v779_v61 = vand.u32 4294901760, %v755_v25 }
  0x69   :  { %694 = vmatpush.msra.mxu2 %v529_v9  ;;  %729 = vmatpush.msra.mxu3 %v1601_v58  ;;  %v756_v9 = vld [vmem:[%s1811_s3 + $0x8] sm:$0xff]  ;;  %s1142_s3 = smov [#allocation2]  }
  0x6a   :  { %696 = vmatmul.f32.vlgmr.msra.gmra.mxu2 %v1654_v11  ;;  %621 = vmatpush.msra.mxu1 %v1601_v58  ;;  %v811_v46 = vsub.f32 %v755_v25, %v779_v61  ;;  %v938_v5 = vand.u32 4294901760, %v756_v9  ;;  %s1096_s12 = sshll.u32 %s1142_s3, 4  ;;  %s1097_s12 = int_to_ptr.vmem [resolvable:$true] %s1096_s12 }
  0x6b   :  { %731 = vmatpush.msra.mxu3 %v1625_v3  ;;  %751 = vperm.xlu0 %1110, %v1777_v45  }
  0x6c   :  { %733 = vmatmul.f32.vlgmr.msra.gmra.mxu3 %v1654_v11  ;;  %623 = vmatpush.msra.mxu1 %v1625_v3  ;;  %v777_v3 = vand.u32 4294901760, %v757_v19  ;;  %v812_v6 = vand.u32 4294901760, %v811_v46  ;;  %v970_v62 = vsub.f32 %v756_v9, %v938_v5 }
  0x6d   :  { %627 = vmatmul.f32.vlgmr.msra.gmra.mxu1 %v430_v52  ;;  %v966_v52 = vsub.f32 %v964_v28, %v965_v39 }
  0x6e   :  { %v805_v30 = vsub.f32 %v757_v19, %v777_v3  ;;  %778 = vmatpush.msrb.mxu0 %v777_v3  ;;  %862 = vmatpush.msrb.mxu3 %v777_v3  ;;  %v813_v53 = vsub.f32 %v811_v46, %v812_v6  ;;  %v971_v41 = vand.u32 4294901760, %v970_v62 }
  0x6f   :  { %v967_v57 = vand.u32 4294901760, %v966_v52 }
  0x70   :  { %v806_v58 = vand.u32 4294901760, %v805_v30  ;;  %837 = vmatpush.msrb.mxu2 %v805_v30  ;;  %864 = vmatpush.msrb.mxu3 %v779_v61  ;;  %v814_v16 = vand.u32 4294901760, %v813_v53  ;;  %v972_v63 = vsub.f32 %v970_v62, %v971_v41 }
  0x71   :  { %780 = vmatpush.msrb.mxu0 %v779_v61 }
  0x72   :  { %v807_v48 = vsub.f32 %v805_v30, %v806_v58  ;;  %840 = vmatpush.msrb.mxu2 %v811_v46  ;;  %968 = vmatpush.msra.mxu3 %v967_v57  ;;  %v973_v12 = vand.u32 4294901760, %v972_v63 }
  0x73   :  { %889 = vmatpush.msra.mxu0 %v806_v58  ;;  %1111 = vset.pattern.permute.xlu0 %v1141_v31 }
  0x74   :  { %v808_v15 = vand.u32 4294901760, %v807_v48  ;;  %937 = vmatpush.msra.mxu2 %v936_v1  ;;  %974 = vmatpush.msra.mxu3 %v973_v12 }
  0x75   :  { %893 = vmatpush.msra.mxu0 %v812_v6  ;;  %1084 = vperm.xlu0 %1111, %v1777_v45  }
  0x76   :  { %809 = vmatpush.msrb.mxu1 %v808_v15  ;;  %939 = vmatpush.msra.mxu2 %v938_v5 }
  0x78   :  { %815 = vmatpush.msrb.mxu1 %v814_v16 }
  0x7a   :  { %914 = vmatpush.msra.mxu1 %v777_v3 }
  0x7c   :  { %916 = vmatpush.msra.mxu1 %v779_v61 }
  0xbc   :  { %v93_v38 = vpop.f32.mrf.mxu0 }
  0xc6   :  { %v194_v37 = vpop.f32.mrf.mxu1 }
  0xc7   :  { %v195_v54 = vadd.f32 %v194_v37, %v93_v38 }
  0xc8   :  { %v248_v56 = vpop.f32.mrf.mxu2  ;;  %v287_v49 = vpop.f32.mrf.mxu3 }
  0xc9   :  { %v249_v43 = vadd.f32 %v248_v56, %v195_v54 }
  0xcb   :  { %v288_v42 = vadd.f32 %v287_v49, %v249_v43 }
  0xcd   :  { %v356_v14 = vpop.f32.mrf.mxu0 }
  0xce   :  { %v357_v32 = vadd.f32 %v356_v14, %v288_v42 }
  0xd0   :  { %v393_v13 = vpop.f32.mrf.mxu1 }
  0xd1   :  { %v394_v59 = vadd.f32 %v393_v13, %v357_v32  ;;  %v434_v40 = vpop.f32.mrf.mxu2 }
  0xd3   :  { %v435_v29 = vadd.f32 %v434_v40, %v394_v59 }
  0xd4   :  { %v535_v4 = vpop.f32.mrf.mxu3 }
  0xd5   :  { %v536_v10 = vadd.f32 %v535_v4, %v435_v29 }
  0xdd   :  { %v752_v0 = vpop.permute.xlu0 %751 }
  0xe3   :  { %v589_v2 = vpop.f32.mrf.mxu0 }
  0xe4   :  { %v590_v17 = vadd.f32 %v589_v2, %v536_v10 }
  0xe7   :  { %v1085_v61 = vpop.permute.xlu0 %1084 }
  0xea   :  { %v628_v22 = vpop.f32.mrf.mxu1 }
  0xeb   :  { %v629_v11 = vadd.f32 %v628_v22, %v590_v17 }
  0xed   :  { %v697_v36 = vpop.f32.mrf.mxu2 }
  0xee   :  { %v698_v26 = vadd.f32 %v697_v36, %v629_v11 }
  0xef   :  { %v734_v20 = vpop.f32.mrf.mxu3 }
  0xf0   :  { %v735_v35 = vadd.f32 %v734_v20, %v698_v26 }
  0xf2   :  { %v737_v50 = vmul.f32 0.0625, %v735_v35 }
  0xf4   :  { %v738_v51 = vadd.f32 1e-06, %v737_v50 }
  0xf6   :  { %1112 = vrsqrt.f32 %v738_v51  ;;  %vm745_vm1 = vweird.f32 %v738_v51 }
  0xfc   :  { %v1113_v34 = vpop.eup %1112 }
  0xfd   :  { %v740_v44 = vmul.f32 %v1113_v34, %v738_v51  ;;  %vm746_vm0 = vweird.f32 %v1113_v34 }
  0xfe   :  { %vm747_vm2 = vmor %vm745_vm1, %vm746_vm0 }
  0xff   :  { %v741_v18 = vmul.f32 %v1113_v34, %v740_v44 }
 0x101   :  { %v742_v55 = vmul.f32 0.5, %v741_v18 }
 0x103   :  { %v743_v8 = vsub.f32 1.5, %v742_v55 }
 0x105   :  { %v744_v33 = vmul.f32 %v1113_v34, %v743_v8 }
 0x107   :  { %v748_v27 = vsel %vm747_vm2, %v1113_v34, %v744_v33 }
 0x108   :  { %v754_v47 = vmul.f32 %v752_v0, %v748_v27 }
 0x10a   :  { %v761_v23 = vsel %vm759_vm3, %v754_v47, 0 }
 0x10b   :  { %v781_v24 = vand.u32 4294901760, %v761_v23 }
 0x10d   :  { %v782_v37 = vsub.f32 %v761_v23, %v781_v24  ;;  %817 = vmatmul.f32.vlgmr.msrb.gmra.mxu1 %v781_v24 }
 0x10e   :  { %1021 = vmatpush.msrb.mxu1 %v936_v1 }
 0x10f   :  { %843 = vmatmul.f32.vlgmr.msrb.gmra.mxu2 %v782_v37  ;;  %v783_v38 = vand.u32 4294901760, %v782_v37 }
 0x110   :  { %1048 = vmatpush.msrb.mxu2 %v965_v39  ;;  %1023 = vmatpush.msrb.mxu1 %v938_v5 }
 0x111   :  { %868 = vmatmul.f32.vlgmr.msrb.gmra.mxu3 %v783_v38  ;;  %v784_v54 = vsub.f32 %v782_v37, %v783_v38 }
 0x112   :  { %1073 = vmatpush.msrb.mxu3 %v936_v1  ;;  %1052 = vmatpush.msrb.mxu2 %v971_v41 }
 0x113   :  { %v785_v56 = vand.u32 4294901760, %v784_v54 }
 0x114   :  { %1075 = vmatpush.msrb.mxu3 %v938_v5 }
 0x115   :  { %786 = vmatmul.f32.vlgmr.msrb.gmra.mxu0 %v785_v56  ;;  %918 = vmatmul.f32.vlgmr.msra.gmra.mxu1 %v781_v24 }
 0x116   :  { %996 = vmatpush.msrb.mxu0 %v964_v28 }
 0x117   :  { %945 = vmatmul.f32.vlgmr.msra.gmra.mxu2 %v785_v56 }
 0x118   :  { %999 = vmatpush.msrb.mxu0 %v970_v62 }
 0x119   :  { %976 = vmatmul.f32.vlgmr.msra.gmra.mxu3 %v781_v24 }
 0x11d   :  { %895 = vmatmul.f32.vlgmr.msra.gmra.mxu0 %v781_v24  ;;  %1027 = vmatmul.f32.vlgmr.msrb.gmra.mxu1 %v783_v38 }
 0x11f   :  { %1054 = vmatmul.f32.vlgmr.msrb.gmra.mxu2 %v781_v24 }
 0x121   :  { %1077 = vmatmul.f32.vlgmr.msrb.gmra.mxu3 %v781_v24 }
 0x125   :  { %1002 = vmatmul.f32.vlgmr.msrb.gmra.mxu0 %v782_v37 }
 0x18a   :  { %v818_v45 = vpop.f32.mrf.mxu1 }
 0x192   :  { %v787_v43 = vpop.f32.mrf.mxu0  ;;  %v844_v49 = vpop.f32.mrf.mxu2 }
 0x193   :  { %v819_v42 = vadd.f32 %v818_v45, %v787_v43  ;;  %v919_v59 = vpop.f32.mrf.mxu1 }
 0x194   :  { %v869_v14 = vpop.f32.mrf.mxu3 }
 0x195   :  { %v845_v32 = vadd.f32 %v844_v49, %v819_v42 }
 0x197   :  { %v870_v13 = vadd.f32 %v869_v14, %v845_v32 }
 0x19a   :  { %v896_v19 = vpop.f32.mrf.mxu0  ;;  %v946_v3 = vpop.f32.mrf.mxu2 }
 0x19b   :  { %v897_v40 = vadd.f32 %v896_v19, %v870_v13  ;;  %v1028_v48 = vpop.f32.mrf.mxu1 }
 0x19c   :  { %v977_v30 = vpop.f32.mrf.mxu3 }
 0x19d   :  { %v920_v25 = vadd.f32 %v919_v59, %v897_v40  ;;  %v978_v4 = vadd.f32 %v977_v30, %v946_v3 }
 0x19f   :  { %v1081_v29 = vmul.f32 %v920_v25, %v1517_v7 }
 0x1a1   :  { %v1087_v58 = vadd.f32 %v1085_v61, %v1081_v29 }
 0x1a2   :  { %v1003_v46 = vpop.f32.mrf.mxu0  ;;  %v1055_v10 = vpop.f32.mrf.mxu2 }
 0x1a3   :  { %1089 = vst [vmem:[#allocation2] sm:$0xff] %v1087_v58  ;;  %v1004_v2 = vadd.f32 %v1003_v46, %v978_v4 }
 0x1a4   :  { %v1078_v53 = vpop.f32.mrf.mxu3 }
 0x1a5   :  { %v1029_v6 = vadd.f32 %v1028_v48, %v1004_v2 }
 0x1a7   :  { %v1056_v15 = vadd.f32 %v1055_v10, %v1029_v6 }
 0x1a9   :  { %v1079_v17 = vadd.f32 %v1078_v53, %v1056_v15 }
 0x1ab   :  { %v1082_v22 = vmul.f32 %v1079_v17, %v1612_v60 }
 0x1ad   :  { %v1088_v7 = vadd.f32 %v1085_v61, %v1082_v22 }
 0x1af   :  { %1090 = vst [vmem:[#allocation2 + $0x8] sm:$0xff] %v1088_v7 }
 0x1b0   :  { %1101 = dma.vmem_to_hbm [thread:$0]  %s1097_s12, 256, %s1099_s15, [#allocation3]  }
 0x1b1   :  { %1138 = dma.done.wait [#allocation3], 256  }
 0x1b2   :  { %1139 = vsyncadd [#allocation3], 4294967040 }
 0x1b3   :  { %1106 = vsyncpa [#allocation3], 1 }

</bundles_post_ra>
